<compile_context>
chip_gen: v7x
topology: tpu7x:2x2x1
jax: 0.10.0
libtpu: 0.0.40
codegen_flags: <defaults>
</compile_context>

<pallas_src>
import functools

import jax
import jax.numpy as jnp
from jax.experimental import pallas as pl
from jax.experimental.pallas import tpu as pltpu


def _elu(x):
    # ELU(alpha=1): x if x > 0 else exp(x) - 1   (computed in f32)
    return jnp.where(x > 0, x, jnp.exp(x) - 1.0)


def vampnet_kernel(x_ref, w0_ref, b0_ref, w1_ref, b1_ref, w2_ref, b2_ref,
                   o_ref, *, approx_recip=True):
    cdt = w0_ref.dtype  # matmul operand dtype (bf16 fast path / f32 exact path)

    x = x_ref[...]

    # embedding_module: Linear -> ELU   (MXU accumulates in f32)
    h = jnp.dot(x, w0_ref[...], preferred_element_type=jnp.float32) + b0_ref[...]
    h = _elu(h)

    # encoder hidden: Linear -> ELU
    h = jnp.dot(h.astype(cdt), w1_ref[...],
                preferred_element_type=jnp.float32) + b1_ref[...]
    h = _elu(h)

    # encoder output: Linear -> Softmax (soft state assignments chi), f32 math
    logits = jnp.dot(h.astype(cdt), w2_ref[...],
                     preferred_element_type=jnp.float32) + b2_ref[...]
    m = jnp.max(logits, axis=-1, keepdims=True)
    e = jnp.exp(logits - m)
    denom = jnp.sum(e, axis=-1, keepdims=True)
    inv = pl.reciprocal(denom, approx=approx_recip)
    o_ref[...] = (e * inv).astype(o_ref.dtype)


def _round_up(n, m):
    return ((n + m - 1) // m) * m


def vampnet_forward(x, params, *, batch_tile=1024,
                    compute_dtype=jnp.bfloat16, approx_recip=True):
    """Fused VAMPNet forward pass.

    x: [B, IN] float32
    params: dict with w0 [IN,HID], b0 [1,HID], w1 [HID,HID], b1 [1,HID],
            w2 [HID,OUT], b2 [1,OUT]   (all float32; matmul operands are cast
            to `compute_dtype`, accumulation and elementwise math stay f32)
    """
    B, IN = x.shape
    HID = params["w0"].shape[1]
    OUT = params["w2"].shape[1]

    # Sublane alignment for the batch (second-to-last) block dim:
    # 8 rows for f32, 16 for bf16 sublane packing.
    row_align = 8 * (4 // jnp.dtype(compute_dtype).itemsize)
    bt = min(batch_tile, _round_up(B, row_align))
    bt = _round_up(bt, row_align)
    b_pad = _round_up(B, bt)

    xp = x if b_pad == B else jnp.pad(x, ((0, b_pad - B), (0, 0)))
    xc = xp.astype(compute_dtype)
    w0 = params["w0"].astype(compute_dtype)
    w1 = params["w1"].astype(compute_dtype)
    w2 = params["w2"].astype(compute_dtype)
    b0 = params["b0"].astype(jnp.float32)
    b1 = params["b1"].astype(jnp.float32)
    b2 = params["b2"].astype(jnp.float32)

    grid = (b_pad // bt,)

    out = pl.pallas_call(
        functools.partial(vampnet_kernel, approx_recip=approx_recip),
        out_shape=jax.ShapeDtypeStruct((b_pad, OUT), jnp.float32),
        grid=grid,
        in_specs=[
            # x streams over the batch grid axis.
            pl.BlockSpec((bt, IN), lambda i: (i, 0)),
            # Weights / biases: same block every step -> DMA'd once, resident.
            pl.BlockSpec((IN, HID), lambda i: (0, 0)),
            pl.BlockSpec((1, HID), lambda i: (0, 0)),
            pl.BlockSpec((HID, HID), lambda i: (0, 0)),
            pl.BlockSpec((1, HID), lambda i: (0, 0)),
            pl.BlockSpec((HID, OUT), lambda i: (0, 0)),
            pl.BlockSpec((1, OUT), lambda i: (0, 0)),
        ],
        out_specs=pl.BlockSpec((bt, OUT), lambda i: (i, 0)),
        compiler_params=pltpu.CompilerParams(
            dimension_semantics=("parallel",)),
    )(xc, w0, b0, w1, b1, w2, b2)

    return out[:B]


def vampnet_reference(x, params):
    h = _elu(x @ params["w0"] + params["b0"])
    h = _elu(h @ params["w1"] + params["b1"])
    logits = h @ params["w2"] + params["b2"]
    return jax.nn.softmax(logits, axis=-1)


def init_params(key, in_dim, hid_dim, out_dim):
    ks = jax.random.split(key, 6)
    s0 = 1.0 / jnp.sqrt(in_dim)
    s1 = 1.0 / jnp.sqrt(hid_dim)
    return {
        "w0": jax.random.uniform(ks[0], (in_dim, hid_dim), jnp.float32, -s0, s0),
        "b0": jax.random.uniform(ks[1], (1, hid_dim), jnp.float32, -s0, s0),
        "w1": jax.random.uniform(ks[2], (hid_dim, hid_dim), jnp.float32, -s1, s1),
        "b1": jax.random.uniform(ks[3], (1, hid_dim), jnp.float32, -s1, s1),
        "w2": jax.random.uniform(ks[4], (hid_dim, out_dim), jnp.float32, -s1, s1),
        "b2": jax.random.uniform(ks[5], (1, out_dim), jnp.float32, -s1, s1),
    }


if __name__ == "__main__":
    # Small shapes: 16 frames, 16 input features, hidden 32, 8 output states.
    B, IN, HID, OUT = 16, 16, 32, 8
    LAG = 1  # VAMPNet lag_time

    key = jax.random.PRNGKey(0)
    kx, kp = jax.random.split(key)

    # Sequential trajectory -> time-lagged pairs (create_time_lagged_dataset).
    traj = jax.random.normal(kx, (B + LAG, IN), jnp.float32)
    n_samples = traj.shape[0] - LAG
    x_t0 = traj[:n_samples]
    x_t1 = traj[LAG:LAG + n_samples]

    params = init_params(kp, IN, HID, OUT)

    # Exact path (f32 operands + exact reciprocal): tight numerical check.
    chi_exact = vampnet_forward(x_t0, params,
                                compute_dtype=jnp.float32, approx_recip=False)
    # Fast path (bf16 operands, f32 accumulation, approx EUP reciprocal).
    chi_t0 = vampnet_forward(x_t0, params)
    chi_t1 = vampnet_forward(x_t1, params)
    jax.block_until_ready((chi_exact, chi_t0, chi_t1))

    ref_t0 = vampnet_reference(x_t0, params)
    ref_t1 = vampnet_reference(x_t1, params)

    assert chi_exact.shape == (n_samples, OUT)
    assert chi_t0.shape == (n_samples, OUT)
    assert jnp.allclose(chi_exact, ref_t0, atol=1e-5, rtol=1e-5)
    # bf16 operands + approx reciprocal -> looser tolerance.
    assert jnp.allclose(chi_t0, ref_t0, atol=5e-2)
    assert jnp.allclose(chi_t1, ref_t1, atol=5e-2)
    assert jnp.allclose(jnp.sum(chi_t0, axis=-1), 1.0, atol=1e-2)

    # TODO(synk): graph-data branch (edge_index / GNN encoder) and the
    # vamp_score training loop have no clean dense Pallas equivalent here;
    # only the tensor-input forward path is implemented.
    print("KERNEL_OK")
</pallas_src>

<mosaic_0001>
module attributes {stable_mosaic.version = 11 : i64} {
  func.func @vampnet_kernel(%arg0: i32, %arg1: memref<16x16xf32, #tpu.memory_space<vmem>>, %arg2: memref<16x32xf32, #tpu.memory_space<vmem>>, %arg3: memref<1x32xf32, #tpu.memory_space<vmem>>, %arg4: memref<32x32xf32, #tpu.memory_space<vmem>>, %arg5: memref<1x32xf32, #tpu.memory_space<vmem>>, %arg6: memref<32x8xf32, #tpu.memory_space<vmem>>, %arg7: memref<1x8xf32, #tpu.memory_space<vmem>>, %arg8: memref<16x8xf32, #tpu.memory_space<vmem>>) attributes {dimension_semantics = [#tpu.dimension_semantics<parallel>], iteration_bounds = array<i64: 1>, scalar_prefetch = 0 : i64, scratch_operands = 0 : i64, tpu.core_type = #tpu.core_type<tc>, window_params = [{transform_indices = @transform_0, window_bounds = array<i64: 16, 16>}, {pipeline_mode = #tpu.pipeline_mode<synchronous>, transform_indices = @transform_1, window_bounds = array<i64: 16, 32>}, {pipeline_mode = #tpu.pipeline_mode<synchronous>, transform_indices = @transform_2, window_bounds = array<i64: 1, 32>}, {pipeline_mode = #tpu.pipeline_mode<synchronous>, transform_indices = @transform_3, window_bounds = array<i64: 32, 32>}, {pipeline_mode = #tpu.pipeline_mode<synchronous>, transform_indices = @transform_4, window_bounds = array<i64: 1, 32>}, {pipeline_mode = #tpu.pipeline_mode<synchronous>, transform_indices = @transform_5, window_bounds = array<i64: 32, 8>}, {pipeline_mode = #tpu.pipeline_mode<synchronous>, transform_indices = @transform_6, window_bounds = array<i64: 1, 8>}, {transform_indices = @transform_7, window_bounds = array<i64: 16, 8>}]} {
    %c0 = arith.constant 0 : index
    %c0_0 = arith.constant 0 : index
    %0 = vector.load %arg1[%c0, %c0_0] : memref<16x16xf32, #tpu.memory_space<vmem>>, vector<16x16xf32>
    %c0_1 = arith.constant 0 : index
    %c0_2 = arith.constant 0 : index
    %1 = vector.load %arg2[%c0_1, %c0_2] : memref<16x32xf32, #tpu.memory_space<vmem>>, vector<16x32xf32>
    %cst = arith.constant dense<0.000000e+00> : vector<16x32xf32>
    %2 = tpu.matmul %0, %1, %cst {dimension_numbers = #tpu.dot_dimension_numbers<[1], [0], [0], [1], [0, 0, 1, 1], [], []>} : vector<16x16xf32>, vector<16x32xf32>, vector<16x32xf32> -> vector<16x32xf32>
    %c0_3 = arith.constant 0 : index
    %c0_4 = arith.constant 0 : index
    %3 = vector.load %arg3[%c0_3, %c0_4] : memref<1x32xf32, #tpu.memory_space<vmem>>, vector<1x32xf32>
    %4 = vector.broadcast %3 : vector<1x32xf32> to vector<16x32xf32>
    %5 = arith.addf %2, %4 : vector<16x32xf32>
    %cst_5 = arith.constant 0.000000e+00 : f32
    %6 = vector.broadcast %cst_5 : f32 to vector<16x32xf32>
    %7 = arith.cmpf ogt, %5, %6 : vector<16x32xf32>
    %8 = math.exp %5 : vector<16x32xf32>
    %cst_6 = arith.constant 1.000000e+00 : f32
    %9 = vector.broadcast %cst_6 : f32 to vector<16x32xf32>
    %10 = arith.subf %8, %9 : vector<16x32xf32>
    %11 = arith.select %7, %5, %10 : vector<16x32xi1>, vector<16x32xf32>
    %c0_7 = arith.constant 0 : index
    %c0_8 = arith.constant 0 : index
    %12 = vector.load %arg4[%c0_7, %c0_8] : memref<32x32xf32, #tpu.memory_space<vmem>>, vector<32x32xf32>
    %cst_9 = arith.constant dense<0.000000e+00> : vector<16x32xf32>
    %13 = tpu.matmul %11, %12, %cst_9 {dimension_numbers = #tpu.dot_dimension_numbers<[1], [0], [0], [1], [0, 0, 1, 1], [], []>} : vector<16x32xf32>, vector<32x32xf32>, vector<16x32xf32> -> vector<16x32xf32>
    %c0_10 = arith.constant 0 : index
    %c0_11 = arith.constant 0 : index
    %14 = vector.load %arg5[%c0_10, %c0_11] : memref<1x32xf32, #tpu.memory_space<vmem>>, vector<1x32xf32>
    %15 = vector.broadcast %14 : vector<1x32xf32> to vector<16x32xf32>
    %16 = arith.addf %13, %15 : vector<16x32xf32>
    %cst_12 = arith.constant 0.000000e+00 : f32
    %17 = vector.broadcast %cst_12 : f32 to vector<16x32xf32>
    %18 = arith.cmpf ogt, %16, %17 : vector<16x32xf32>
    %19 = math.exp %16 : vector<16x32xf32>
    %cst_13 = arith.constant 1.000000e+00 : f32
    %20 = vector.broadcast %cst_13 : f32 to vector<16x32xf32>
    %21 = arith.subf %19, %20 : vector<16x32xf32>
    %22 = arith.select %18, %16, %21 : vector<16x32xi1>, vector<16x32xf32>
    %c0_14 = arith.constant 0 : index
    %c0_15 = arith.constant 0 : index
    %23 = vector.load %arg6[%c0_14, %c0_15] : memref<32x8xf32, #tpu.memory_space<vmem>>, vector<32x8xf32>
    %cst_16 = arith.constant dense<0.000000e+00> : vector<16x8xf32>
    %24 = tpu.matmul %22, %23, %cst_16 {dimension_numbers = #tpu.dot_dimension_numbers<[1], [0], [0], [1], [0, 0, 1, 1], [], []>} : vector<16x32xf32>, vector<32x8xf32>, vector<16x8xf32> -> vector<16x8xf32>
    %c0_17 = arith.constant 0 : index
    %c0_18 = arith.constant 0 : index
    %25 = vector.load %arg7[%c0_17, %c0_18] : memref<1x8xf32, #tpu.memory_space<vmem>>, vector<1x8xf32>
    %26 = vector.broadcast %25 : vector<1x8xf32> to vector<16x8xf32>
    %27 = arith.addf %24, %26 : vector<16x8xf32>
    %cst_19 = arith.constant dense<0xFF800000> : vector<16xf32>
    %28 = vector.multi_reduction <maximumf>, %27, %cst_19 [1] : vector<16x8xf32> to vector<16xf32>
    %29 = vector.shape_cast %28 : vector<16xf32> to vector<16x1xf32>
    %30 = vector.broadcast %29 : vector<16x1xf32> to vector<16x8xf32>
    %31 = arith.subf %27, %30 : vector<16x8xf32>
    %32 = math.exp %31 : vector<16x8xf32>
    %cst_20 = arith.constant dense<0.000000e+00> : vector<16xf32>
    %33 = vector.multi_reduction <add>, %32, %cst_20 [1] : vector<16x8xf32> to vector<16xf32>
    %34 = vector.shape_cast %33 : vector<16xf32> to vector<16x1xf32>
    %35 = tpu.reciprocal %34 : vector<16x1xf32> -> vector<16x1xf32>
    %36 = vector.broadcast %35 : vector<16x1xf32> to vector<16x8xf32>
    %37 = arith.mulf %32, %36 : vector<16x8xf32>
    %c0_21 = arith.constant 0 : index
    %c0_22 = arith.constant 0 : index
    %38 = vector.load %arg8[%c0_21, %c0_22] : memref<16x8xf32, #tpu.memory_space<vmem>>, vector<16x8xf32>
    tpu.vector_store %arg8[%c0_21, %c0_22], %37 {strides = array<i32>} : memref<16x8xf32, #tpu.memory_space<vmem>>, vector<16x8xf32>,
    return
  }
  func.func @transform_0(%arg0: i32) -> (i32, i32) {
    %c0_i32 = arith.constant 0 : i32
    %c0_i32_0 = arith.constant 0 : i32
    return %arg0, %c0_i32 : i32, i32
  }
  func.func @transform_1(%arg0: i32) -> (i32, i32) {
    %c0_i32 = arith.constant 0 : i32
    %c0_i32_0 = arith.constant 0 : i32
    %c0_i32_1 = arith.constant 0 : i32
    return %c0_i32, %c0_i32_0 : i32, i32
  }
  func.func @transform_2(%arg0: i32) -> (i32, i32) {
    %c0_i32 = arith.constant 0 : i32
    %c0_i32_0 = arith.constant 0 : i32
    %c0_i32_1 = arith.constant 0 : i32
    return %c0_i32, %c0_i32_0 : i32, i32
  }
  func.func @transform_3(%arg0: i32) -> (i32, i32) {
    %c0_i32 = arith.constant 0 : i32
    %c0_i32_0 = arith.constant 0 : i32
    %c0_i32_1 = arith.constant 0 : i32
    return %c0_i32, %c0_i32_0 : i32, i32
  }
  func.func @transform_4(%arg0: i32) -> (i32, i32) {
    %c0_i32 = arith.constant 0 : i32
    %c0_i32_0 = arith.constant 0 : i32
    %c0_i32_1 = arith.constant 0 : i32
    return %c0_i32, %c0_i32_0 : i32, i32
  }
  func.func @transform_5(%arg0: i32) -> (i32, i32) {
    %c0_i32 = arith.constant 0 : i32
    %c0_i32_0 = arith.constant 0 : i32
    %c0_i32_1 = arith.constant 0 : i32
    return %c0_i32, %c0_i32_0 : i32, i32
  }
  func.func @transform_6(%arg0: i32) -> (i32, i32) {
    %c0_i32 = arith.constant 0 : i32
    %c0_i32_0 = arith.constant 0 : i32
    %c0_i32_1 = arith.constant 0 : i32
    return %c0_i32, %c0_i32_0 : i32, i32
  }
  func.func @transform_7(%arg0: i32) -> (i32, i32) {
    %c0_i32 = arith.constant 0 : i32
    %c0_i32_0 = arith.constant 0 : i32
    return %arg0, %c0_i32 : i32, i32
  }
}

</mosaic_0001>

<bundles_post_ra>
// kernel: tpu_custom_call.1
= control target key start
LH: loop header
LB: loop body
LE: loop exit
PB: predicated region body
PF: predicated region fallthrough
CT: control target
= control target key end

     0   :  { %12 = vsyncpa [#allocation3], 0  ;;  %s489_s24 = smov [#allocation2]   ;;  %s599_s0 = inlined_call_operand.vmem [shape: f32[16,16], index: 0, kind: input, shape index: {}]   ;;  %s600_s1 = inlined_call_operand.hbm [shape: f32[16,32], index: 1, kind: input, shape index: {}]   ;;  %s601_s2 = inlined_call_operand.vmem [shape: f32[1,32], index: 2, kind: input, shape index: {}]   ;;  %s602_s3 = inlined_call_operand.vmem [shape: f32[32,32], index: 3, kind: input, shape index: {}]   ;;  %s603_s4 = inlined_call_operand.vmem [shape: f32[1,32], index: 4, kind: input, shape index: {}]   ;;  %s604_s5 = inlined_call_operand.vmem [shape: f32[32,8], index: 5, kind: input, shape index: {}]   ;;  %s605_s6 = inlined_call_operand.vmem [shape: f32[1,8], index: 6, kind: input, shape index: {}]   ;;  %s606_s7 = inlined_call_operand.vmem [shape: f32[16,8], index: 7, kind: output, shape index: {}]  }
   0x1   :  { %s20_s25 = sshll.u32 %s489_s24, 4  ;;  %s465_s28 = scalar_lea.hbm %s600_s1, 256  ;;  %s21_s25 = int_to_ptr.vmem [resolvable:$true] %s20_s25 }
   0x2   :  { %p466_p0 = scmp.ne.s32.totalorder %s600_s1, %s465_s28  ;;  %p469_p1 = scmp.lt.u32.totalorder %s465_s28, %s600_s1 }
   0x4   :  { %p471_p2 = pnand %p469_p1, %p466_p0 }
   0x6   :  { %474 = shalt.err (!%p471_p2)
}
   0x7   :  { %s475_s10 = scalar_lea.vmem %s21_s25, 256  ;;  %p480_p4 = scmp.lt.s32.totalorder %s21_s25, %s21_s25 }
   0x8   :  { %p476_p3 = scmp.ne.s32.totalorder %s21_s25, %s475_s10  ;;  %p481_p5 = scmp.lt.s32.totalorder %s475_s10, %s475_s10 }
   0xa   :  { %p482_p6 = por %p481_p5, %p480_p4 }
   0xc   :  { %p483_p7 = pnand %p482_p6, %p476_p3 }
   0xe   :  { %486 = shalt.err (!%p483_p7)
}
   0xf   :  { %s490_s11 = smov 128   ;;  %s491_s12 = smov 8  }
  0x10   :  { %26 = dma.hbm_to_vmem [thread:$0]  %s600_s1, 256, %s21_s25, [#allocation3], %s490_s11, %s490_s11, %s491_s12  }
  0x11   :  { %487 = dma.done.wait [#allocation3], 256  }
  0x12   :  { %488 = vsyncadd [#allocation3], 4294967040  ;;  %vm51_vm0 = vcmask 130048   ;;  %v42_v0 = vld [vmem:[#allocation2] sm:$0xff]  ;;  %v43_v1 = vld [vmem:[#allocation2 + $0x8] sm:$0xff]  ;;  %vm154_vm1 = vcmask 261120  }
  0x13   :  { %v40_v2 = vld [vmem:[%s599_s0] sm:$0xff]  ;;  %v426_v3 = vpack.c.bf16 %v43_v1, %v42_v0  ;;  %v41_v4 = vld [vmem:[%s599_s0 + $0x8] sm:$0xff]  ;;  %v145_v7 = vld [vmem:[%s602_s3 + $0x10] sm:$0xff]  ;;  %vm338_vm6 = vcmask 64512  }
  0x14   :  { %401 = vmatprep.mubr.msk.f32.mxu0 %vm51_vm0, %v40_v2  ;;  %v143_v5 = vld [vmem:[%s602_s3] sm:$0xff]  ;;  %v144_v6 = vld [vmem:[%s602_s3 + $0x8] sm:$0xff]  ;;  %v146_v9 = vld [vmem:[%s602_s3 + $0x18] sm:$0xff] }
  0x15   :  { %427 = vmatprep.subr.bf16.mxu0 %v426_v3  ;;  %v430_v8 = vpack.c.bf16 %v144_v6, %v143_v5  ;;  %v434_v10 = vpack.c.bf16 %v146_v9, %v145_v7  ;;  %v368_v11 = vld [vmem:[%s601_s2] ss:$0 sm:$0xff]  ;;  %v247_v25 = vld [vmem:[%s604_s5 + $0x8] sm:$0xff]  ;;  %v248_v27 = vld [vmem:[%s604_s5 + $0x10] sm:$0xff] }
  0x16   :  { %429 = vmatpush3.bf16.msra.mxu0 %v426_v3  ;;  %v246_v24 = vld [vmem:[%s604_s5] sm:$0xff]  ;;  %v249_v28 = vld [vmem:[%s604_s5 + $0x18] sm:$0xff] }
  0x17   :  { %431 = vmatprep.subr.bf16.mxu1 %v430_v8  ;;  %v438_v26 = vpack.c.bf16 %v247_v25, %v246_v24  ;;  %v442_v29 = vpack.c.bf16 %v249_v28, %v248_v27  ;;  %v373_v30 = vld [vmem:[%s603_s4] ss:$0 sm:$0xff] }
  0x18   :  { %433 = vmatpush3.bf16.msra.mxu1 %v430_v8  ;;  %v378_v43 = vld [vmem:[%s605_s6] ss:$0 sm:$0xff] }
  0x19   :  { %402 = vmatmul.mubr.msk.f32.vlgmr.msra.gmra.mrb[0].mxu0 %vm51_vm0, %v41_v4  ;;  %435 = vmatprep.subr.bf16.mxu1 %v434_v10 }
  0x1a   :  { %439 = vmatprep.subr.bf16.mxu0 %v438_v26 }
  0x1b   :  { %441 = vmatpush3.bf16.msra.mxu0 %v438_v26 }
  0x1c   :  { %437 = vmatpush3.bf16.msra.mxu1 %v434_v10  ;;  %443 = vmatprep.subr.bf16.mxu0 %v442_v29 }
  0x1f   :  { %445 = vmatpush3.bf16.msra.mxu0 %v442_v29 }
  0xec   :  { %v403_v12 = vpop.f32.mrb[0].mxu0 }
  0xed   :  { %v130_v13 = vadd.f32 %v403_v12, %v368_v11  ;;  %v124_v14 = vpop.f32.mrb[1].mxu0 }
  0xee   :  { %v125_v15 = vadd.f32 %v368_v11, %v124_v14 }
  0xef   :  { %v137_v16 = vmul.f32 1.442695, %v130_v13  ;;  %vm134_vm3 = vcmp.gt.f32.partialorder %v130_v13, 0.0 }
  0xf0   :  { %v135_v17 = vmul.f32 1.442695, %v125_v15  ;;  %vm133_vm2 = vcmp.gt.f32.partialorder %v125_v15, 0.0 }
  0xf1   :  { %449 = vpow2.f32 %v137_v16 }
  0xf2   :  { %451 = vpow2.f32 %v135_v17 }
  0xfb   :  { %v450_v18 = vpop.eup %449 }
  0xfc   :  { %v452_v19 = vpop.eup %451  ;;  %v372_v20 = vadd.f32 -1.0, %v450_v18 }
  0xfd   :  { %v371_v21 = vadd.f32 -1.0, %v452_v19 }
  0xfe   :  { %v142_v23 = vsel %vm134_vm3, %v130_v13, %v372_v20 }
  0xff   :  { %v141_v22 = vsel %vm133_vm2, %v125_v15, %v371_v21 }
 0x100   :  { %412 = vmatprep.mubr.msk.f32.mxu1 %vm154_vm1, %v141_v22 }
 0x101   :  { %413 = vmatmul.mubr.msk.f32.vlgmr.msra.gmra.mrb[0].mxu1 %vm154_vm1, %v142_v23 }
 0x1d4   :  { %v414_v31 = vpop.f32.mrb[0].mxu1 }
 0x1d5   :  { %v233_v32 = vadd.f32 %v414_v31, %v373_v30  ;;  %v227_v33 = vpop.f32.mrb[1].mxu1 }
 0x1d6   :  { %v228_v34 = vadd.f32 %v373_v30, %v227_v33 }
 0x1d7   :  { %v240_v35 = vmul.f32 1.442695, %v233_v32  ;;  %vm237_vm5 = vcmp.gt.f32.partialorder %v233_v32, 0.0 }
 0x1d8   :  { %v238_v36 = vmul.f32 1.442695, %v228_v34  ;;  %vm236_vm4 = vcmp.gt.f32.partialorder %v228_v34, 0.0 }
 0x1d9   :  { %453 = vpow2.f32 %v240_v35 }
 0x1da   :  { %455 = vpow2.f32 %v238_v36 }
 0x1e3   :  { %v454_v37 = vpop.eup %453 }
 0x1e4   :  { %v456_v38 = vpop.eup %455  ;;  %v377_v39 = vadd.f32 -1.0, %v454_v37 }
 0x1e5   :  { %v376_v40 = vadd.f32 -1.0, %v456_v38 }
 0x1e6   :  { %v245_v42 = vsel %vm237_vm5, %v233_v32, %v377_v39 }
 0x1e7   :  { %v244_v41 = vsel %vm236_vm4, %v228_v34, %v376_v40 }
 0x1e8   :  { %423 = vmatprep.mubr.msk.f32.mxu0 %vm154_vm1, %v244_v41 }
 0x1e9   :  { %424 = vmatmul.mubr.msk.f32.vlgmr.msra.gmra.mrb[2].mxu0 %vm154_vm1, %v245_v42 }
 0x2bc   :  { %v425_v44 = vpop.f32.mrb[2].mxu0 }
 0x2bd   :  { %v329_v45 = vpop.f32.mrb[3].mxu0  ;;  %v335_v47 = vadd.f32 %v425_v44, %v378_v43 }
 0x2be   :  { %v330_v46 = vadd.f32 %v378_v43, %v329_v45 }
 0x2bf   :  { %v342_v49 = vsel %vm338_vm6, %v335_v47, -inf }
 0x2c0   :  { %v339_v48 = vsel %vm338_vm6, %v330_v46, -inf }
 0x2c1   :  { %340 = vmax.xlane.f32.xlu0 %v339_v48 }
 0x2c5   :  { %343 = vmax.xlane.f32.xlu0 %v342_v49 }
 0x34e   :  { %v341_v50 = vpop.xlane.xlu0 %340 }
 0x34f   :  { %v345_v51 = vsub.f32 %v330_v46, %v341_v50 }
 0x351   :  { %v347_v52 = vmul.f32 1.442695, %v345_v51 }
 0x352   :  { %v344_v53 = vpop.xlane.xlu0 %343 }
 0x353   :  { %457 = vpow2.f32 %v347_v52  ;;  %v346_v54 = vsub.f32 %v335_v47, %v344_v53 }
 0x355   :  { %v349_v55 = vmul.f32 1.442695, %v346_v54 }
 0x357   :  { %459 = vpow2.f32 %v349_v55 }
 0x35d   :  { %v458_v56 = vpop.eup %457 }
 0x35e   :  { %v351_v57 = vsel %vm338_vm6, %v458_v56, 0.0 }
 0x35f   :  { %352 = vadd.xlane.f32.xlu1 %v351_v57 }
 0x361   :  { %v460_v58 = vpop.eup %459 }
 0x362   :  { %v354_v59 = vsel %vm338_vm6, %v460_v58, 0.0 }
 0x363   :  { %355 = vadd.xlane.f32.xlu1 %v354_v59 }
 0x3ec   :  { %v353_v60 = vpop.xlane.xlu1 %352 }
 0x3ed   :  { %461 = vrcp.f32 %v353_v60 }
 0x3f0   :  { %v356_v61 = vpop.xlane.xlu1 %355 }
 0x3f1   :  { %463 = vrcp.f32 %v356_v61 }
 0x3f7   :  { %v462_v62 = vpop.eup %461 }
 0x3f8   :  { %v359_v63 = vmul.f32 %v462_v62, %v458_v56 }
 0x3fa   :  { %361 = vst.msk [vmem:[%s606_s7] sm:$0xff] %vm338_vm6, %v359_v63 }
 0x3fb   :  { %v464_v0 = vpop.eup %463 }
 0x3fc   :  { %v360_v1 = vmul.f32 %v464_v0, %v460_v58 }
 0x3fe   :  { %362 = vst.msk [vmem:[%s606_s7 + $0x8] sm:$0xff] %vm338_vm6, %v360_v1 }
 0x3ff   :  { %367 = vsyncpa [#allocation3], 1 }

</bundles_post_ra>
